<compile_context>
chip_gen: v7x
topology: tpu7x:2x2x1
jax: 0.10.0
libtpu: 0.0.40
codegen_flags: <defaults>
</compile_context>

<pallas_src>
import functools

import jax
import jax.numpy as jnp
from jax.experimental import pallas as pl
from jax.experimental.pallas import tpu as pltpu

LANE = 128


def _round_up(n, m):
    return (n + m - 1) // m * m


def mlp_kernel(x_ref, w1_ref, b1_ref, w2_ref, b2_ref, w3_ref, b3_ref, o_ref):
    # bf16 operands -> MXU, f32 accumulation; epilogues in f32.
    x = x_ref[...]                                                      # (tm, S) bf16
    h1 = jnp.dot(x, w1_ref[...], preferred_element_type=jnp.float32) + b1_ref[...]
    h1 = jnp.maximum(h1, 0.0)
    h2 = jnp.dot(h1.astype(jnp.bfloat16), w2_ref[...],
                 preferred_element_type=jnp.float32) + b2_ref[...]
    h2 = jnp.maximum(h2, 0.0)
    h3 = jnp.dot(h2.astype(jnp.bfloat16), w3_ref[...],
                 preferred_element_type=jnp.float32) + b3_ref[...]
    o_ref[...] = jnp.tanh(h3).astype(o_ref.dtype)                       # (tm, 128)


def prepare_params(params):
    """One-time parameter prep (run OUTSIDE the hot path).

    Pads fc3 out-features to a full 128-lane block and casts matmul operands
    to bf16; biases stay f32 for the f32 epilogue."""
    w1, b1, w2, b2, w3, b3 = params
    a = w3.shape[1]
    a_pad = _round_up(a, LANE)
    w3p = jnp.zeros((w3.shape[0], a_pad), w3.dtype).at[:, :a].set(w3)
    b3p = jnp.zeros((1, a_pad), b3.dtype).at[:, :a].set(b3)
    return (
        w1.astype(jnp.bfloat16), b1.astype(jnp.float32),
        w2.astype(jnp.bfloat16), b2.astype(jnp.float32),
        w3p.astype(jnp.bfloat16), b3p.astype(jnp.float32),
    )


@functools.partial(jax.jit, static_argnames=("num_actions", "block_m", "out_dtype"))
def mlp_forward(x, prepared, *, num_actions, block_m=512, out_dtype=jnp.bfloat16):
    w1b, b1, w2b, b2, w3b, b3p = prepared
    B, S = x.shape
    H1 = w1b.shape[1]
    H2 = w2b.shape[1]
    Hp = w3b.shape[1]                       # lane-padded action dim (128)

    # --- batch tiling: 16-row aligned (bf16 sublane pack); keep >=2 grid ----
    # --- steps when the batch allows so v7x's two TensorCores both work. ----
    B16 = _round_up(B, 16)
    if B16 >= 32:
        tm = min(block_m, _round_up((B16 + 1) // 2, 16))
    else:
        tm = B16
    B_pad = _round_up(B, tm)
    nb = B_pad // tm

    # --- x: cast to bf16 once; pad only when actually required --------------
    x_b = x if x.dtype == jnp.bfloat16 else x.astype(jnp.bfloat16)
    if B_pad != B:
        x_b = jnp.zeros((B_pad, S), jnp.bfloat16).at[:B, :].set(x_b)

    # weights/biases: full block, constant index -> VMEM-resident; single
    # buffer (never re-fetched, no need to double-buffer them).
    const = lambda a: pl.BlockSpec(a.shape, lambda i: (0,) * a.ndim,
                                   pipeline_mode=pl.Buffered(1))

    flops = 2 * B_pad * (S * H1 + H1 * H2 + H2 * Hp)
    bytes_accessed = (
        x_b.size * x_b.dtype.itemsize
        + sum(a.size * a.dtype.itemsize for a in prepared)
        + B_pad * Hp * jnp.dtype(out_dtype).itemsize)

    out = pl.pallas_call(
        mlp_kernel,
        out_shape=jax.ShapeDtypeStruct((B_pad, Hp), out_dtype),
        grid=(nb,),
        in_specs=[
            pl.BlockSpec((tm, S), lambda i: (i, 0)),   # x: tiled over batch
            const(w1b), const(b1),
            const(w2b), const(b2),
            const(w3b), const(b3p),
        ],
        out_specs=pl.BlockSpec((tm, Hp), lambda i: (i, 0)),
        compiler_params=pltpu.CompilerParams(
            dimension_semantics=("parallel",)),        # megacore split on v7x
        cost_estimate=pl.CostEstimate(
            flops=flops,
            transcendentals=B_pad * Hp,                # tanh
            bytes_accessed=bytes_accessed),
    )(x_b, w1b, b1, w2b, b2, w3b, b3p)

    # NOTE: padded rows [B:B_pad] contain tanh(relu(b)...) garbage, not zeros;
    # they are sliced off here.
    return out[:B, :num_actions]


def init_linear(key, fan_in, fan_out):
    """PyTorch nn.Linear default init: U(-1/sqrt(fan_in), 1/sqrt(fan_in))."""
    kw, kb = jax.random.split(key)
    bound = 1.0 / jnp.sqrt(jnp.float32(fan_in))
    # stored as (in, out) so forward is x @ W
    w = jax.random.uniform(kw, (fan_in, fan_out), jnp.float32, -bound, bound)
    b = jax.random.uniform(kb, (1, fan_out), jnp.float32, -bound, bound)
    return w, b


if __name__ == "__main__":
    state_size, action_size = 24, 4
    fc1_units, fc2_units = 256, 256

    key = jax.random.PRNGKey(0)
    k_x, k_x2, k1, k2, k3 = jax.random.split(key, 5)

    w1, b1 = init_linear(k1, state_size, fc1_units)
    w2, b2 = init_linear(k2, fc1_units, fc2_units)
    w3, b3 = init_linear(k3, fc2_units, action_size)
    params = (w1, b1, w2, b2, w3, b3)

    # one-time parameter preparation (hoisted out of the forward hot path)
    prepared = prepare_params(params)

    def reference(x):
        h1 = jnp.maximum(x @ w1 + b1, 0.0)
        h2 = jnp.maximum(h1 @ w2 + b2, 0.0)
        return jnp.tanh(h2 @ w3 + b3)

    # small batch (single grid tile, 16-row aligned)
    x_small = jax.random.normal(k_x, (8, state_size), jnp.float32)
    out_small = jax.block_until_ready(
        mlp_forward(x_small, prepared, num_actions=action_size))
    assert out_small.shape == (8, action_size)
    assert jnp.allclose(out_small.astype(jnp.float32), reference(x_small),
                        atol=3e-2, rtol=3e-2)

    # larger batch exercising the 2-step batch grid + padding
    x_big = jax.random.normal(k_x2, (300, state_size), jnp.float32)
    out_big = jax.block_until_ready(
        mlp_forward(x_big, prepared, num_actions=action_size))
    assert out_big.shape == (300, action_size)
    assert jnp.allclose(out_big.astype(jnp.float32), reference(x_big),
                        atol=3e-2, rtol=3e-2)

    print("KERNEL_OK")
</pallas_src>

<mosaic_0001>
module attributes {stable_mosaic.version = 11 : i64} {
  func.func @mlp_kernel(%arg0: i32, %arg1: memref<16x24xbf16, #tpu.memory_space<vmem>>, %arg2: memref<24x256xbf16, #tpu.memory_space<vmem>>, %arg3: memref<1x256xf32, #tpu.memory_space<vmem>>, %arg4: memref<256x256xbf16, #tpu.memory_space<vmem>>, %arg5: memref<1x256xf32, #tpu.memory_space<vmem>>, %arg6: memref<256x128xbf16, #tpu.memory_space<vmem>>, %arg7: memref<1x128xf32, #tpu.memory_space<vmem>>, %arg8: memref<16x128xbf16, #tpu.memory_space<vmem>>) attributes {dimension_semantics = [#tpu.dimension_semantics<parallel>], iteration_bounds = array<i64: 1>, scalar_prefetch = 0 : i64, scratch_operands = 0 : i64, tpu.core_type = #tpu.core_type<tc>, window_params = [{transform_indices = @transform_0, window_bounds = array<i64: 16, 24>}, {pipeline_mode = #tpu.pipeline_mode<synchronous>, transform_indices = @transform_1, window_bounds = array<i64: 24, 256>}, {pipeline_mode = #tpu.pipeline_mode<synchronous>, transform_indices = @transform_2, window_bounds = array<i64: 1, 256>}, {pipeline_mode = #tpu.pipeline_mode<synchronous>, transform_indices = @transform_3, window_bounds = array<i64: 256, 256>}, {pipeline_mode = #tpu.pipeline_mode<synchronous>, transform_indices = @transform_4, window_bounds = array<i64: 1, 256>}, {pipeline_mode = #tpu.pipeline_mode<synchronous>, transform_indices = @transform_5, window_bounds = array<i64: 256, 128>}, {pipeline_mode = #tpu.pipeline_mode<synchronous>, transform_indices = @transform_6, window_bounds = array<i64: 1, 128>}, {transform_indices = @transform_7, window_bounds = array<i64: 16, 128>}]} {
    %c0 = arith.constant 0 : index
    %c0_0 = arith.constant 0 : index
    %0 = vector.load %arg1[%c0, %c0_0] : memref<16x24xbf16, #tpu.memory_space<vmem>>, vector<16x24xbf16>
    %c0_1 = arith.constant 0 : index
    %c0_2 = arith.constant 0 : index
    %1 = vector.load %arg2[%c0_1, %c0_2] : memref<24x256xbf16, #tpu.memory_space<vmem>>, vector<24x256xbf16>
    %cst = arith.constant dense<0.000000e+00> : vector<16x256xf32>
    %2 = tpu.matmul %0, %1, %cst {dimension_numbers = #tpu.dot_dimension_numbers<[1], [0], [0], [1], [0, 0, 1, 1], [], []>} : vector<16x24xbf16>, vector<24x256xbf16>, vector<16x256xf32> -> vector<16x256xf32>
    %c0_3 = arith.constant 0 : index
    %c0_4 = arith.constant 0 : index
    %3 = vector.load %arg3[%c0_3, %c0_4] : memref<1x256xf32, #tpu.memory_space<vmem>>, vector<1x256xf32>
    %4 = vector.broadcast %3 : vector<1x256xf32> to vector<16x256xf32>
    %5 = arith.addf %2, %4 : vector<16x256xf32>
    %cst_5 = arith.constant 0.000000e+00 : f32
    %6 = vector.broadcast %cst_5 : f32 to vector<16x256xf32>
    %7 = arith.maximumf %5, %6 : vector<16x256xf32>
    %8 = arith.truncf %7 : vector<16x256xf32> to vector<16x256xbf16>
    %c0_6 = arith.constant 0 : index
    %c0_7 = arith.constant 0 : index
    %9 = vector.load %arg4[%c0_6, %c0_7] : memref<256x256xbf16, #tpu.memory_space<vmem>>, vector<256x256xbf16>
    %cst_8 = arith.constant dense<0.000000e+00> : vector<16x256xf32>
    %10 = tpu.matmul %8, %9, %cst_8 {dimension_numbers = #tpu.dot_dimension_numbers<[1], [0], [0], [1], [0, 0, 1, 1], [], []>} : vector<16x256xbf16>, vector<256x256xbf16>, vector<16x256xf32> -> vector<16x256xf32>
    %c0_9 = arith.constant 0 : index
    %c0_10 = arith.constant 0 : index
    %11 = vector.load %arg5[%c0_9, %c0_10] : memref<1x256xf32, #tpu.memory_space<vmem>>, vector<1x256xf32>
    %12 = vector.broadcast %11 : vector<1x256xf32> to vector<16x256xf32>
    %13 = arith.addf %10, %12 : vector<16x256xf32>
    %cst_11 = arith.constant 0.000000e+00 : f32
    %14 = vector.broadcast %cst_11 : f32 to vector<16x256xf32>
    %15 = arith.maximumf %13, %14 : vector<16x256xf32>
    %16 = arith.truncf %15 : vector<16x256xf32> to vector<16x256xbf16>
    %c0_12 = arith.constant 0 : index
    %c0_13 = arith.constant 0 : index
    %17 = vector.load %arg6[%c0_12, %c0_13] : memref<256x128xbf16, #tpu.memory_space<vmem>>, vector<256x128xbf16>
    %cst_14 = arith.constant dense<0.000000e+00> : vector<16x128xf32>
    %18 = tpu.matmul %16, %17, %cst_14 {dimension_numbers = #tpu.dot_dimension_numbers<[1], [0], [0], [1], [0, 0, 1, 1], [], []>} : vector<16x256xbf16>, vector<256x128xbf16>, vector<16x128xf32> -> vector<16x128xf32>
    %c0_15 = arith.constant 0 : index
    %c0_16 = arith.constant 0 : index
    %19 = vector.load %arg7[%c0_15, %c0_16] : memref<1x128xf32, #tpu.memory_space<vmem>>, vector<1x128xf32>
    %20 = vector.broadcast %19 : vector<1x128xf32> to vector<16x128xf32>
    %21 = arith.addf %18, %20 : vector<16x128xf32>
    %22 = math.tanh %21 : vector<16x128xf32>
    %23 = arith.truncf %22 : vector<16x128xf32> to vector<16x128xbf16>
    %c0_17 = arith.constant 0 : index
    %c0_18 = arith.constant 0 : index
    %24 = vector.load %arg8[%c0_17, %c0_18] : memref<16x128xbf16, #tpu.memory_space<vmem>>, vector<16x128xbf16>
    tpu.vector_store %arg8[%c0_17, %c0_18], %23 {strides = array<i32>} : memref<16x128xbf16, #tpu.memory_space<vmem>>, vector<16x128xbf16>,
    return
  }
  func.func @transform_0(%arg0: i32) -> (i32, i32) {
    %c0_i32 = arith.constant 0 : i32
    %c0_i32_0 = arith.constant 0 : i32
    return %arg0, %c0_i32 : i32, i32
  }
  func.func @transform_1(%arg0: i32) -> (i32, i32) {
    %c0_i32 = arith.constant 0 : i32
    %c0_i32_0 = arith.constant 0 : i32
    %c0_i32_1 = arith.constant 0 : i32
    return %c0_i32, %c0_i32_0 : i32, i32
  }
  func.func @transform_2(%arg0: i32) -> (i32, i32) {
    %c0_i32 = arith.constant 0 : i32
    %c0_i32_0 = arith.constant 0 : i32
    %c0_i32_1 = arith.constant 0 : i32
    return %c0_i32, %c0_i32_0 : i32, i32
  }
  func.func @transform_3(%arg0: i32) -> (i32, i32) {
    %c0_i32 = arith.constant 0 : i32
    %c0_i32_0 = arith.constant 0 : i32
    %c0_i32_1 = arith.constant 0 : i32
    return %c0_i32, %c0_i32_0 : i32, i32
  }
  func.func @transform_4(%arg0: i32) -> (i32, i32) {
    %c0_i32 = arith.constant 0 : i32
    %c0_i32_0 = arith.constant 0 : i32
    %c0_i32_1 = arith.constant 0 : i32
    return %c0_i32, %c0_i32_0 : i32, i32
  }
  func.func @transform_5(%arg0: i32) -> (i32, i32) {
    %c0_i32 = arith.constant 0 : i32
    %c0_i32_0 = arith.constant 0 : i32
    %c0_i32_1 = arith.constant 0 : i32
    return %c0_i32, %c0_i32_0 : i32, i32
  }
  func.func @transform_6(%arg0: i32) -> (i32, i32) {
    %c0_i32 = arith.constant 0 : i32
    %c0_i32_0 = arith.constant 0 : i32
    %c0_i32_1 = arith.constant 0 : i32
    return %c0_i32, %c0_i32_0 : i32, i32
  }
  func.func @transform_7(%arg0: i32) -> (i32, i32) {
    %c0_i32 = arith.constant 0 : i32
    %c0_i32_0 = arith.constant 0 : i32
    return %arg0, %c0_i32 : i32, i32
  }
}

</mosaic_0001>

<bundles_post_ra>
// kernel: mlp_forward.1
= control target key start
LH: loop header
LB: loop body
LE: loop exit
PB: predicated region body
PF: predicated region fallthrough
CT: control target
= control target key end

     0   :  { %12 = vsyncpa [#allocation3], 0  ;;  %s910_s0 = inlined_call_operand.vmem [shape: bf16[16,24], index: 0, kind: input, shape index: {}]   ;;  %s911_s1 = inlined_call_operand.vmem [shape: bf16[24,256], index: 1, kind: input, shape index: {}]   ;;  %s912_s2 = inlined_call_operand.vmem [shape: f32[1,256], index: 2, kind: input, shape index: {}]   ;;  %s913_s3 = inlined_call_operand.hbm [shape: bf16[256,256], index: 3, kind: input, shape index: {}]   ;;  %s914_s4 = inlined_call_operand.vmem [shape: f32[1,256], index: 4, kind: input, shape index: {}]   ;;  %s915_s5 = inlined_call_operand.hbm [shape: bf16[256,128], index: 5, kind: input, shape index: {}]   ;;  %s916_s6 = inlined_call_operand.vmem [shape: f32[1,128], index: 6, kind: input, shape index: {}]   ;;  %s917_s7 = inlined_call_operand.vmem [shape: bf16[16,128], index: 7, kind: output, shape index: {}]  }
   0x1   :  { %13 = vsyncpa [#allocation5], 0  ;;  %s815_s24 = smov [#allocation2]   ;;  %s767_s28 = scalar_lea.hbm %s913_s3, 4096 }
   0x2   :  { %s25_s25 = sshll.u32 %s815_s24, 4  ;;  %p768_p0 = scmp.ne.s32.totalorder %s913_s3, %s767_s28  ;;  %s26_s25 = int_to_ptr.vmem [resolvable:$true] %s25_s25 }
   0x3   :  { %p771_p1 = scmp.lt.u32.totalorder %s767_s28, %s913_s3 }
   0x5   :  { %p773_p2 = pnand %p771_p1, %p768_p0 }
   0x7   :  { %776 = shalt.err (!%p773_p2)
}
   0x8   :  { %s777_s10 = scalar_lea.vmem %s26_s25, 4096  ;;  %p782_p4 = scmp.lt.s32.totalorder %s26_s25, %s26_s25 }
   0x9   :  { %p778_p3 = scmp.ne.s32.totalorder %s26_s25, %s777_s10  ;;  %p783_p5 = scmp.lt.s32.totalorder %s777_s10, %s777_s10 }
   0xb   :  { %p784_p6 = por %p783_p5, %p782_p4 }
   0xd   :  { %p785_p7 = pnand %p784_p6, %p778_p3 }
   0xf   :  { %788 = shalt.err (!%p785_p7)
}
  0x10   :  { %s816_s11 = smov 128   ;;  %s817_s12 = smov 8  }
  0x11   :  { %31 = dma.hbm_to_vmem [thread:$0]  %s913_s3, 4096, %s26_s25, [#allocation3], %s816_s11, %s816_s11, %s817_s12  }
  0x12   :  { %s818_s15 = smov [#allocation4]   ;;  %s789_s19 = scalar_lea.hbm %s915_s5, 2048 }
  0x13   :  { %s39_s16 = sshll.u32 %s818_s15, 4  ;;  %p790_p8 = scmp.ne.s32.totalorder %s915_s5, %s789_s19  ;;  %s40_s16 = int_to_ptr.vmem [resolvable:$true] %s39_s16 }
  0x14   :  { %p793_p9 = scmp.lt.u32.totalorder %s789_s19, %s915_s5 }
  0x16   :  { %p795_p10 = pnand %p793_p9, %p790_p8 }
  0x18   :  { %798 = shalt.err (!%p795_p10)
}
  0x19   :  { %s799_s24 = scalar_lea.vmem %s40_s16, 2048  ;;  %p804_p12 = scmp.lt.s32.totalorder %s40_s16, %s40_s16 }
  0x1a   :  { %p800_p11 = scmp.ne.s32.totalorder %s40_s16, %s799_s24  ;;  %p805_p13 = scmp.lt.s32.totalorder %s799_s24, %s799_s24 }
  0x1c   :  { %p806_p0 = por %p805_p13, %p804_p12 }
  0x1e   :  { %p807_p1 = pnand %p806_p0, %p800_p11 }
  0x20   :  { %810 = shalt.err (!%p807_p1)
}
  0x21   :  { %s819_s3 = smov 64   ;;  %s820_s25 = smov 4  }
  0x22   :  { %45 = dma.hbm_to_vmem [thread:$0]  %s915_s5, 2048, %s40_s16, [#allocation5], %s819_s3, %s819_s3, %s820_s25  }
  0x23   :  { %811 = dma.done.wait [#allocation3], 4096  }
  0x24   :  { %812 = vsyncadd [#allocation3], 4294963200 }
  0x25   :  { %813 = dma.done.wait [#allocation5], 2048  }
  0x26   :  { %814 = vsyncadd [#allocation5], 4294965248  ;;  %v821_v0 = vmov 0   ;;  %v693_v1 = vld [vmem:[%s911_s1 + $0x4] ss:$8 sps:$4 sm:$0xff]   ;;  %v59_v3 = vld [vmem:[%s911_s1 + $0x10] sm:$0xff]  ;;  %v62_v51 = vlaneseq }
  0x27   :  { %135 = vmatprep.mubr.bf16.mxu0 %v821_v0  ;;  %v695_v2 = vld [vmem:[%s911_s1] ss:$8 sps:$4 sm:$0xff]   ;;  %vm96_vm0 = vcmask 1043456   ;;  %103 = vmatprep.subr.bf16.mxu0 %v693_v1  ;;  %v603_v4 = vcombine.high %v59_v3, %v59_v3  ;;  %v602_v5 = vcombine.low %v59_v3, %v59_v3  ;;  %v699_v6 = vld [vmem:[#allocation2 + $0x4] ss:$8 sps:$4 sm:$0xff]   ;;  %vm92_vm1 = vcmask 195584  }
  0x28   :  { %104 = vmatpush1.bf16.msra.mxu0 %v695_v2  ;;  %v701_v7 = vld [vmem:[#allocation2] ss:$8 sps:$4 sm:$0xff]   ;;  %v702_v9 = vld [vmem:[#allocation2 + $0x14] ss:$8 sps:$4 sm:$0xff]   ;;  %356 = vmatprep.subr.bf16.mxu1 %v699_v6  ;;  %v704_v11 = vld [vmem:[#allocation2 + $0x10] ss:$8 sps:$4 sm:$0xff]  }
  0x29   :  { %604 = vmatprep.subr.msk.bf16.mxu0 %vm96_vm0, %v603_v4  ;;  %v98_v8 = vsel %vm96_vm0, %v602_v5, 0  ;;  %v698_v10 = vld [vmem:[%s910_s0] sm:$0xff]   ;;  %357 = vmatpush1.bf16.msra.mxu1 %v701_v7  ;;  %v708_v14 = vld [vmem:[#allocation2 + $0x34] ss:$8 sps:$4 sm:$0xff]   ;;  %v710_v15 = vld [vmem:[#allocation2 + $0x30] ss:$8 sps:$4 sm:$0xff]  }
  0x2a   :  { %358 = vmatprep.subr.bf16.mxu1 %v702_v9  ;;  %v705_v12 = vld [vmem:[#allocation2 + $0x24] ss:$8 sps:$4 sm:$0xff]   ;;  %v707_v13 = vld [vmem:[#allocation2 + $0x20] ss:$8 sps:$4 sm:$0xff]   ;;  %v714_v18 = vld [vmem:[#allocation2 + $0x54] ss:$8 sps:$4 sm:$0xff]  }
  0x2b   :  { %v711_v16 = vld [vmem:[#allocation2 + $0x44] ss:$8 sps:$4 sm:$0xff]   ;;  %v713_v17 = vld [vmem:[#allocation2 + $0x40] ss:$8 sps:$4 sm:$0xff]   ;;  %v716_v19 = vld [vmem:[#allocation2 + $0x50] ss:$8 sps:$4 sm:$0xff]  }
  0x2c   :  { %106 = vmatpush1.bf16.msra.mxu0 %v98_v8  ;;  %v717_v20 = vld [vmem:[#allocation2 + $0x64] ss:$8 sps:$4 sm:$0xff]   ;;  %v719_v21 = vld [vmem:[#allocation2 + $0x60] ss:$8 sps:$4 sm:$0xff]   ;;  %v720_v22 = vld [vmem:[#allocation2 + $0x74] ss:$8 sps:$4 sm:$0xff]  }
  0x2d   :  { %359 = vmatpush1.bf16.msra.mxu1 %v704_v11  ;;  %v722_v23 = vld [vmem:[#allocation2 + $0x70] ss:$8 sps:$4 sm:$0xff]   ;;  %v723_v24 = vld [vmem:[#allocation2 + $0x84] ss:$8 sps:$4 sm:$0xff]   ;;  %v725_v25 = vld [vmem:[#allocation2 + $0x80] ss:$8 sps:$4 sm:$0xff]  }
  0x2e   :  { %360 = vmatprep.subr.bf16.mxu1 %v705_v12  ;;  %v726_v26 = vld [vmem:[#allocation2 + $0x94] ss:$8 sps:$4 sm:$0xff]   ;;  %v728_v27 = vld [vmem:[#allocation2 + $0x90] ss:$8 sps:$4 sm:$0xff]   ;;  %v729_v28 = vld [vmem:[#allocation2 + $0xa4] ss:$8 sps:$4 sm:$0xff]  }
  0x2f   :  { %605 = vmatmul.mubr.msk.bf16.vlgmr.msra.gmra.mrb[0].mxu0 %vm92_vm1, %v698_v10  ;;  %v731_v29 = vld [vmem:[#allocation2 + $0xa0] ss:$8 sps:$4 sm:$0xff]   ;;  %v732_v30 = vld [vmem:[#allocation2 + $0xb4] ss:$8 sps:$4 sm:$0xff]   ;;  %v734_v31 = vld [vmem:[#allocation2 + $0xb0] ss:$8 sps:$4 sm:$0xff]  }
  0x30   :  { %v735_v32 = vld [vmem:[#allocation2 + $0xc4] ss:$8 sps:$4 sm:$0xff]   ;;  %v737_v33 = vld [vmem:[#allocation2 + $0xc0] ss:$8 sps:$4 sm:$0xff]   ;;  %v738_v34 = vld [vmem:[#allocation2 + $0xd4] ss:$8 sps:$4 sm:$0xff]  }
  0x31   :  { %361 = vmatpush1.bf16.msra.mxu1 %v707_v13  ;;  %v740_v35 = vld [vmem:[#allocation2 + $0xd0] ss:$8 sps:$4 sm:$0xff]   ;;  %v741_v36 = vld [vmem:[#allocation2 + $0xe4] ss:$8 sps:$4 sm:$0xff]   ;;  %v743_v37 = vld [vmem:[#allocation2 + $0xe0] ss:$8 sps:$4 sm:$0xff]  }
  0x32   :  { %362 = vmatprep.subr.bf16.mxu1 %v708_v14  ;;  %v744_v38 = vld [vmem:[#allocation2 + $0xf4] ss:$8 sps:$4 sm:$0xff]   ;;  %v746_v39 = vld [vmem:[#allocation2 + $0xf0] ss:$8 sps:$4 sm:$0xff]   ;;  %v747_v40 = vld [vmem:[#allocation4 + $0x40] sm:$0xff]   ;;  %v63_v52 = vshrl.u32 %v62_v51, 7 }
  0x33   :  { %v748_v41 = vld [vmem:[#allocation4] sm:$0xff]   ;;  %v749_v42 = vld [vmem:[#allocation4 + $0x48] sm:$0xff]   ;;  %664 = vmatprep.subr.bf16.mxu0 %v747_v40  ;;  %v751_v44 = vld [vmem:[#allocation4 + $0x50] sm:$0xff]  }
  0x34   :  { %665 = vmatpush3.bf16.msra.mxu0 %v748_v41  ;;  %v750_v43 = vld [vmem:[#allocation4 + $0x8] sm:$0xff]   ;;  %v752_v45 = vld [vmem:[#allocation4 + $0x10] sm:$0xff]   ;;  %v753_v46 = vld [vmem:[#allocation4 + $0x58] sm:$0xff]   ;;  %v64_v53 = vsub.s32 0, %v63_v52  ;;  %v68_v55 = vsub.s32 1, %v63_v52 }
  0x35   :  { %363 = vmatpush1.bf16.msra.mxu1 %v710_v15  ;;  %666 = vmatprep.subr.bf16.mxu0 %v749_v42  ;;  %v754_v47 = vld [vmem:[#allocation4 + $0x18] sm:$0xff]   ;;  %v755_v48 = vld [vmem:[#allocation4 + $0x60] sm:$0xff]   ;;  %v757_v50 = vld [vmem:[#allocation4 + $0x68] sm:$0xff]  }
  0x36   :  { %364 = vmatprep.subr.bf16.mxu1 %v711_v16  ;;  %v756_v49 = vld [vmem:[#allocation4 + $0x20] sm:$0xff]   ;;  %v60_v54 = vld [vmem:[%s912_s2] sm:$0x3]  ;;  %v759_v9 = vld [vmem:[#allocation4 + $0x70] sm:$0xff]  }
  0x37   :  { %v65_v56 = vrot.slane %v60_v54, %v64_v53  ;;  %v69_v57 = vrot.slane %v60_v54, %v68_v55  ;;  %v758_v8 = vld [vmem:[#allocation4 + $0x28] sm:$0xff]   ;;  %v760_v10 = vld [vmem:[#allocation4 + $0x30] sm:$0xff]   ;;  %v761_v11 = vld [vmem:[#allocation4 + $0x78] sm:$0xff]  }
  0x38   :  { %667 = vmatpush3.bf16.msra.mxu0 %v750_v43  ;;  %v762_v12 = vld [vmem:[#allocation4 + $0x38] sm:$0xff]   ;;  %v184_v13 = vld [vmem:[%s914_s4] sm:$0x3] }
  0x39   :  { %365 = vmatpush1.bf16.msra.mxu1 %v713_v17  ;;  %668 = vmatprep.subr.bf16.mxu0 %v751_v44  ;;  %v189_v14 = vrot.slane %v184_v13, %v64_v53  ;;  %v193_v15 = vrot.slane %v184_v13, %v68_v55 }
  0x3a   :  { %366 = vmatprep.subr.bf16.mxu1 %v714_v18 }
  0x3c   :  { %669 = vmatpush3.bf16.msra.mxu0 %v752_v45 }
  0x3d   :  { %367 = vmatpush1.bf16.msra.mxu1 %v716_v19  ;;  %670 = vmatprep.subr.bf16.mxu0 %v753_v46 }
  0x3e   :  { %368 = vmatprep.subr.bf16.mxu1 %v717_v20 }
  0x40   :  { %671 = vmatpush3.bf16.msra.mxu0 %v754_v47 }
  0x41   :  { %369 = vmatpush1.bf16.msra.mxu1 %v719_v21  ;;  %672 = vmatprep.subr.bf16.mxu0 %v755_v48 }
  0x42   :  { %370 = vmatprep.subr.bf16.mxu1 %v720_v22 }
  0x44   :  { %673 = vmatpush3.bf16.msra.mxu0 %v756_v49 }
  0x45   :  { %371 = vmatpush1.bf16.msra.mxu1 %v722_v23  ;;  %674 = vmatprep.subr.bf16.mxu0 %v757_v50 }
  0x46   :  { %372 = vmatprep.subr.bf16.mxu1 %v723_v24 }
  0x48   :  { %675 = vmatpush3.bf16.msra.mxu0 %v758_v8 }
  0x49   :  { %373 = vmatpush1.bf16.msra.mxu1 %v725_v25  ;;  %676 = vmatprep.subr.bf16.mxu0 %v759_v9 }
  0x4a   :  { %374 = vmatprep.subr.bf16.mxu1 %v726_v26 }
  0x4c   :  { %677 = vmatpush3.bf16.msra.mxu0 %v760_v10 }
  0x4d   :  { %375 = vmatpush1.bf16.msra.mxu1 %v728_v27  ;;  %678 = vmatprep.subr.bf16.mxu0 %v761_v11 }
  0x4e   :  { %376 = vmatprep.subr.bf16.mxu1 %v729_v28 }
  0x50   :  { %679 = vmatpush3.bf16.msra.mxu0 %v762_v12 }
  0x51   :  { %377 = vmatpush1.bf16.msra.mxu1 %v731_v29 }
  0x52   :  { %378 = vmatprep.subr.bf16.mxu1 %v732_v30 }
  0x55   :  { %379 = vmatpush1.bf16.msra.mxu1 %v734_v31  ;;  %v638_v31 = vld [vmem:[%s916_s6] ss:$0 sm:$0xff] }
  0x56   :  { %380 = vmatprep.subr.bf16.mxu1 %v735_v32 }
  0x59   :  { %381 = vmatpush1.bf16.msra.mxu1 %v737_v33 }
  0x5a   :  { %382 = vmatprep.subr.bf16.mxu1 %v738_v34 }
  0x5d   :  { %383 = vmatpush1.bf16.msra.mxu1 %v740_v35 }
  0x5e   :  { %384 = vmatprep.subr.bf16.mxu1 %v741_v36 }
  0x61   :  { %385 = vmatpush1.bf16.msra.mxu1 %v743_v37 }
  0x62   :  { %386 = vmatprep.subr.bf16.mxu1 %v744_v38 }
  0x65   :  { %387 = vmatpush1.bf16.msra.mxu1 %v746_v39 }
 0x102   :  { %v137_v58 = vpop.f32.mrb[0].mxu0 }
 0x103   :  { %v138_v59 = vadd.f32 %v137_v58, %v65_v56  ;;  %v139_v60 = vpop.f32.mrb[1].mxu0 }
 0x104   :  { %v140_v61 = vadd.f32 %v139_v60, %v69_v57  ;;  %v141_v62 = vpop.f32.mrb[2].mxu0 }
 0x105   :  { %v142_v63 = vadd.f32 %v141_v62, %v65_v56  ;;  %v143_v0 = vpop.f32.mrb[3].mxu0  ;;  %v146_v2 = vmax.f32 %v138_v59, 0.0 }
 0x106   :  { %v144_v1 = vadd.f32 %v143_v0, %v69_v57  ;;  %v147_v4 = vmax.f32 %v140_v61, 0.0 }
 0x107   :  { %v148_v3 = vmax.f32 %v142_v63, 0.0 }
 0x108   :  { %v149_v5 = vmax.f32 %v144_v1, 0.0 }
 0x109   :  { %v150_v6 = vpack.c.bf16 %v148_v3, %v146_v2 }
 0x10a   :  { %v151_v7 = vpack.c.bf16 %v149_v5, %v147_v4 }
 0x10c   :  { %388 = vmatprep.mubr.bf16.mxu1 %v151_v7 }
 0x10d   :  { %389 = vmatmul.mubr.bf16.vlgmr.msra.gmra.mrb[0].mxu1 %v150_v6 }
 0x1e0   :  { %v390_v16 = vpop.f32.mrb[0].mxu1 }
 0x1e1   :  { %v391_v17 = vadd.f32 %v390_v16, %v189_v14  ;;  %v392_v18 = vpop.f32.mrb[1].mxu1 }
 0x1e2   :  { %v393_v19 = vadd.f32 %v392_v18, %v193_v15  ;;  %v394_v20 = vpop.f32.mrb[2].mxu1 }
 0x1e3   :  { %v395_v21 = vadd.f32 %v394_v20, %v189_v14  ;;  %v396_v22 = vpop.f32.mrb[3].mxu1  ;;  %v399_v24 = vmax.f32 %v391_v17, 0.0 }
 0x1e4   :  { %v397_v23 = vadd.f32 %v396_v22, %v193_v15  ;;  %v400_v26 = vmax.f32 %v393_v19, 0.0 }
 0x1e5   :  { %v401_v25 = vmax.f32 %v395_v21, 0.0 }
 0x1e6   :  { %v402_v27 = vmax.f32 %v397_v23, 0.0 }
 0x1e7   :  { %v403_v28 = vpack.c.bf16 %v401_v25, %v399_v24 }
 0x1e8   :  { %v404_v29 = vpack.c.bf16 %v402_v27, %v400_v26 }
 0x1ea   :  { %572 = vmatprep.mubr.bf16.mxu0 %v404_v29 }
 0x1eb   :  { %573 = vmatmul.mubr.bf16.vlgmr.msra.gmra.mrb[4].mxu0 %v403_v28 }
 0x2be   :  { %v680_v30 = vpop.f32.mrb[4].mxu0 }
 0x2bf   :  { %v681_v32 = vpop.f32.mrb[5].mxu0 }
 0x2c0   :  { %v682_v33 = vadd.f32 %v681_v32, %v680_v30  ;;  %v683_v34 = vpop.f32.mrb[6].mxu0 }
 0x2c1   :  { %v684_v35 = vpop.f32.mrb[7].mxu0 }
 0x2c2   :  { %v575_v36 = vadd.f32 %v682_v33, %v638_v31  ;;  %v685_v37 = vadd.f32 %v684_v35, %v683_v34 }
 0x2c4   :  { %v578_v38 = vadd.f32 %v685_v37, %v638_v31  ;;  %763 = vtanh.f32 %v575_v36 }
 0x2c6   :  { %765 = vtanh.f32 %v578_v38 }
 0x2ce   :  { %v764_v39 = vpop.eup %763 }
 0x2d0   :  { %v766_v40 = vpop.eup %765 }
 0x2d1   :  { %v662_v41 = vpack.c.bf16 %v766_v40, %v764_v39 }
 0x2d3   :  { %663 = vst [vmem:[%s917_s7] sm:$0xff] %v662_v41  }
 0x2d4   :  { %597 = vsyncpa [#allocation3], 1 }
 0x2d5   :  { %598 = vsyncpa [#allocation5], 1 }

</bundles_post_ra>
